<compile_context>
chip_gen: v7x
topology: tpu7x:2x2x1
jax: 0.10.0
libtpu: 0.0.40
codegen_flags: <defaults>
</compile_context>

<pallas_src>
import functools

import jax
import jax.numpy as jnp
import numpy as np
from jax import lax
from jax.experimental import pallas as pl
from jax.experimental.pallas import tpu as pltpu


# --------------------------------------------------------------------------- #
# Kernel
# --------------------------------------------------------------------------- #
def _cgem_kernel(gamma, eps, mm_dtype,
                 c_ref, rr_ref, rc_ref,
                 wf_ref, wb_ref, wfc_ref, bfc_ref, lnw_ref, lnb_ref,
                 o_ref):
    Bb, N, D = c_ref.shape

    x3 = c_ref[...]                              # (Bb, N, D) f32
    x2 = x3.reshape(Bb * N, D)                   # collapse leading dims (cheap)
    xm = x2.astype(mm_dtype)

    # ---- f_dir / b_dir projections (weights pre-cast to mm_dtype in wrapper) ----
    f_emb = jnp.dot(xm, wf_ref[...],
                    preferred_element_type=jnp.float32).reshape(Bb, N, D)
    b_emb = jnp.dot(xm, wb_ref[...],
                    preferred_element_type=jnp.float32).reshape(Bb, N, D)

    # ---- pseudo adjacency (torch.no_grad in reference; forward values equal) ----
    rr = rr_ref[...]                             # (Bb, N, 1)
    rc = rc_ref[...]                             # (Bb, 1, N)
    # clip once; 1 - clip(x,0,1) == clip(1-x,0,1); pre-clip diagonal is exactly
    # 0.5, so "-eye then clip" == "clip then zero the diagonal".
    p_a = jnp.clip((rr - rc + gamma) * (0.5 / gamma), 0.0, 1.0)   # (Bb, N, N)
    p_b = 1.0 - p_a
    diag = (lax.broadcasted_iota(jnp.int32, (N, N), 0) ==
            lax.broadcasted_iota(jnp.int32, (N, N), 1))[None]     # (1, N, N)
    p_a = jnp.where(diag, 0.0, p_a)
    p_b = jnp.where(diag, 0.0, p_b)

    # _get_asymmetric_norm: Dinv @ A == A / rowsum(A)  (exact division).
    p_a = p_a / jnp.sum(p_a, axis=-1, keepdims=True)
    p_b = p_b / jnp.sum(p_b, axis=-1, keepdims=True)

    # ---- aggregation: two accumulating (batched) einsums, no concatenation ----
    g = (jnp.einsum("bnm,bmd->bnd",
                    p_a.astype(mm_dtype), f_emb.astype(mm_dtype),
                    preferred_element_type=jnp.float32)
         + jnp.einsum("bnm,bmd->bnd",
                      p_b.astype(mm_dtype), b_emb.astype(mm_dtype),
                      preferred_element_type=jnp.float32))        # (Bb, N, D) f32

    # ---- fc + LayerNorm + residual on the flattened (Bb*N, D) slab (all f32) ----
    g2 = g.reshape(Bb * N, D)
    h = jnp.dot(g2.astype(mm_dtype), wfc_ref[...],
                preferred_element_type=jnp.float32) + bfc_ref[...]
    mu = jnp.mean(h, axis=-1, keepdims=True)
    var = jnp.mean((h - mu) ** 2, axis=-1, keepdims=True)
    h = (h - mu) * lax.rsqrt(var + eps)
    h = h * lnw_ref[...] + lnb_ref[...]

    o_ref[...] = (x2 + h).reshape(Bb, N, D)


# --------------------------------------------------------------------------- #
# Block-size heuristic: largest batch_block that leaves >= min_steps grid steps
# and whose per-step VMEM footprint fits the budget.
# --------------------------------------------------------------------------- #
def _default_batch_block(B, N, D, *, budget_bytes, mm_itemsize, weight_bufs,
                         min_steps):
    target_steps = min(min_steps, B)

    def footprint(bb):
        io = 4 * 2 * (2 * bb * N * D + 2 * bb * N)        # c in/out + rel, x2 buffers
        inter = 4 * bb * N * (2 * N + 4 * D)              # p_a, p_b, f, b, g/h (f32)
        wts = weight_bufs * mm_itemsize * 3 * D * D + 2 * 4 * 3 * D
        return io + inter + wts

    candidates = [bb for bb in range(1, B + 1)
                  if B % bb == 0 and B // bb >= target_steps]
    fitting = [bb for bb in candidates if footprint(bb) <= budget_bytes]
    return max(fitting) if fitting else 1


# --------------------------------------------------------------------------- #
# Wrapper
# --------------------------------------------------------------------------- #
def concept_gcn_forward(c_emb, rel, params, *, gamma=1.0, eps=1e-5,
                        batch_block=None, matmul_dtype=jnp.bfloat16,
                        min_grid_steps=4, vmem_limit_bytes=48 * 1024 * 1024,
                        weight_buffer_count=None):
    """Pallas ConceptGCN forward.

    c_emb: (B, N, D) float32, rel: (B, N) float32.
    matmul_dtype: bfloat16 (default, native MXU dtype) for the three matmuls;
      elementwise math is always f32.  Pass jnp.float32 for an exact check.
    batch_block: batch elements per grid step.  Default: picked so the grid has
      >= min_grid_steps steps while the per-step footprint fits ~half of
      vmem_limit_bytes.  v7x guidance: min_grid_steps=8 (>=4 steps per TC),
      weight_buffer_count=1, and keep vmem_limit_bytes <= 48 MiB (64 MiB phys).
    weight_buffer_count: set 1 to single-buffer the grid-invariant weight
      blocks (pl.Buffered); None keeps the default double-buffering.
    """
    B, N, D = c_emb.shape
    c_emb = c_emb.astype(jnp.float32)
    rel = rel.astype(jnp.float32)
    mm_itemsize = jnp.dtype(matmul_dtype).itemsize

    if batch_block is None:
        batch_block = _default_batch_block(
            B, N, D,
            budget_bytes=vmem_limit_bytes // 2,
            mm_itemsize=mm_itemsize,
            weight_bufs=weight_buffer_count or 2,
            min_steps=min_grid_steps)
    assert B % batch_block == 0, "batch_block must divide B"
    grid = (B // batch_block,)

    rel_row = rel[:, :, None]                    # (B, N, 1) — free reshape
    rel_col = rel[:, None, :]                    # (B, 1, N) — free reshape

    # PyTorch Linear computes x @ W.T -> pre-transpose; pre-cast to matmul dtype.
    wf_t = params["w_f"].T.astype(matmul_dtype)
    wb_t = params["w_b"].T.astype(matmul_dtype)
    wfc_t = params["w_fc"].T.astype(matmul_dtype)
    bfc = params["b_fc"].reshape(1, D).astype(jnp.float32)
    lnw = params["ln_w"].reshape(1, D).astype(jnp.float32)
    lnb = params["ln_b"].reshape(1, D).astype(jnp.float32)

    kernel = functools.partial(_cgem_kernel, float(gamma), float(eps),
                               matmul_dtype)

    def _weight_spec(shape):
        if weight_buffer_count is not None:
            return pl.BlockSpec(shape, lambda b: (0,) * len(shape),
                                pipeline_mode=pl.Buffered(weight_buffer_count))
        return pl.BlockSpec(shape, lambda b: (0,) * len(shape))

    grid_spec = pltpu.PrefetchScalarGridSpec(
        num_scalar_prefetch=0,
        grid=grid,
        in_specs=[
            pl.BlockSpec((batch_block, N, D), lambda b: (b, 0, 0)),  # c_emb
            pl.BlockSpec((batch_block, N, 1), lambda b: (b, 0, 0)),  # rel rows
            pl.BlockSpec((batch_block, 1, N), lambda b: (b, 0, 0)),  # rel cols
            _weight_spec((D, D)),                                    # Wf^T
            _weight_spec((D, D)),                                    # Wb^T
            _weight_spec((D, D)),                                    # Wfc^T
            _weight_spec((1, D)),                                    # fc bias
            _weight_spec((1, D)),                                    # LN weight
            _weight_spec((1, D)),                                    # LN bias
        ],
        out_specs=pl.BlockSpec((batch_block, N, D), lambda b: (b, 0, 0)),
    )

    cost = pl.CostEstimate(
        flops=int(2 * B * N * D * (3 * D + 2 * N)),
        transcendentals=int(3 * B * N),
        bytes_accessed=int(4 * (2 * B * N * D + B * N + 6 * D)
                           + 3 * D * D * mm_itemsize),
    )

    # NOTE: under jit in production, add input_output_aliases={0: 0} to donate
    # the activation buffer (c_emb -> output); omitted here so the eager demo
    # can keep reusing c_emb.
    return pl.pallas_call(
        kernel,
        out_shape=jax.ShapeDtypeStruct((B, N, D), jnp.float32),
        grid_spec=grid_spec,
        cost_estimate=cost,
        compiler_params=pltpu.CompilerParams(
            dimension_semantics=("parallel",),
            vmem_limit_bytes=vmem_limit_bytes,
        ),
    )(c_emb, rel_row, rel_col, wf_t, wb_t, wfc_t, bfc, lnw, lnb)


# --------------------------------------------------------------------------- #
# Pure-JAX reference mirroring the PyTorch forward exactly
# --------------------------------------------------------------------------- #
def concept_gcn_reference(c_emb, rel, params, *, gamma=1.0, eps=1e-5):
    B, N, D = c_emb.shape
    f_emb = c_emb @ params["w_f"].T
    b_emb = c_emb @ params["w_b"].T
    p_a = (rel[:, :, None] - rel[:, None, :] + gamma) / (2.0 * gamma)
    p_b = 1.0 - p_a
    eye = jnp.eye(N, dtype=c_emb.dtype)
    p_a = jnp.clip(p_a - eye, 0.0, 1.0)
    p_b = jnp.clip(p_b - eye, 0.0, 1.0)
    p_a = p_a / jnp.sum(p_a, axis=-1, keepdims=True)
    p_b = p_b / jnp.sum(p_b, axis=-1, keepdims=True)
    g = (jnp.einsum("bnm,bmd->bnd", p_a, f_emb)
         + jnp.einsum("bnm,bmd->bnd", p_b, b_emb))
    h = g @ params["w_fc"].T + params["b_fc"]
    mu = jnp.mean(h, axis=-1, keepdims=True)
    var = jnp.mean((h - mu) ** 2, axis=-1, keepdims=True)
    h = (h - mu) / jnp.sqrt(var + eps)
    h = h * params["ln_w"] + params["ln_b"]
    return c_emb + h


if __name__ == "__main__":
    key = jax.random.PRNGKey(0)
    B, N, D = 2, 8, 32

    k1, k2, k3, k4, k5, k6 = jax.random.split(key, 6)
    c_emb = jax.random.normal(k1, (B, N, D), dtype=jnp.float32)
    rel = jax.random.uniform(k2, (B, N), dtype=jnp.float32)

    scale = 1.0 / np.sqrt(D)
    params = {
        "w_f": jax.random.normal(k3, (D, D), dtype=jnp.float32) * scale,
        "w_b": jax.random.normal(k4, (D, D), dtype=jnp.float32) * scale,
        "w_fc": jax.random.normal(k5, (D, D), dtype=jnp.float32) * scale,
        "b_fc": jax.random.normal(k6, (D,), dtype=jnp.float32) * scale,
        "ln_w": jnp.ones((D,), dtype=jnp.float32),   # PyTorch LayerNorm default
        "ln_b": jnp.zeros((D,), dtype=jnp.float32),
    }

    ref = concept_gcn_reference(c_emb, rel, params, gamma=1.0)

    # Exact-math variant (f32 matmuls, exact degree normalization): tight check.
    out_f32 = concept_gcn_forward(c_emb, rel, params, gamma=1.0,
                                  matmul_dtype=jnp.float32)
    out_f32 = jax.block_until_ready(out_f32)
    np.testing.assert_allclose(np.asarray(out_f32), np.asarray(ref),
                               rtol=1e-3, atol=1e-3)

    # Production-default variant (bf16 MXU operands, f32 elementwise): sanity.
    out_bf16 = concept_gcn_forward(c_emb, rel, params, gamma=1.0)
    out_bf16 = jax.block_until_ready(out_bf16)
    max_err = float(jnp.max(jnp.abs(out_bf16 - ref)))
    assert np.isfinite(max_err) and max_err < 0.25, f"bf16 sanity failed: {max_err}"

    print("KERNEL_OK")
</pallas_src>

<mosaic_0001>
module attributes {stable_mosaic.version = 11 : i64} {
  func.func @_cgem_kernel(%arg0: i32, %arg1: memref<1x8x32xf32, #tpu.memory_space<vmem>>, %arg2: memref<1x8x1xf32, #tpu.memory_space<vmem>>, %arg3: memref<1x1x8xf32, #tpu.memory_space<vmem>>, %arg4: memref<32x32xf32, #tpu.memory_space<vmem>>, %arg5: memref<32x32xf32, #tpu.memory_space<vmem>>, %arg6: memref<32x32xf32, #tpu.memory_space<vmem>>, %arg7: memref<1x32xf32, #tpu.memory_space<vmem>>, %arg8: memref<1x32xf32, #tpu.memory_space<vmem>>, %arg9: memref<1x32xf32, #tpu.memory_space<vmem>>, %arg10: memref<1x8x32xf32, #tpu.memory_space<vmem>>) attributes {dimension_semantics = [#tpu.dimension_semantics<parallel>], iteration_bounds = array<i64: 2>, scalar_prefetch = 0 : i64, scratch_operands = 0 : i64, tpu.core_type = #tpu.core_type<tc>, window_params = [{transform_indices = @transform_0, window_bounds = array<i64: 1, 8, 32>}, {transform_indices = @transform_1, window_bounds = array<i64: 1, 8, 1>}, {transform_indices = @transform_2, window_bounds = array<i64: 1, 1, 8>}, {pipeline_mode = #tpu.pipeline_mode<synchronous>, transform_indices = @transform_3, window_bounds = array<i64: 32, 32>}, {pipeline_mode = #tpu.pipeline_mode<synchronous>, transform_indices = @transform_4, window_bounds = array<i64: 32, 32>}, {pipeline_mode = #tpu.pipeline_mode<synchronous>, transform_indices = @transform_5, window_bounds = array<i64: 32, 32>}, {pipeline_mode = #tpu.pipeline_mode<synchronous>, transform_indices = @transform_6, window_bounds = array<i64: 1, 32>}, {pipeline_mode = #tpu.pipeline_mode<synchronous>, transform_indices = @transform_7, window_bounds = array<i64: 1, 32>}, {pipeline_mode = #tpu.pipeline_mode<synchronous>, transform_indices = @transform_8, window_bounds = array<i64: 1, 32>}, {transform_indices = @transform_9, window_bounds = array<i64: 1, 8, 32>}]} {
    %c0 = arith.constant 0 : index
    %c0_0 = arith.constant 0 : index
    %c0_1 = arith.constant 0 : index
    %0 = vector.load %arg1[%c0, %c0_0, %c0_1] : memref<1x8x32xf32, #tpu.memory_space<vmem>>, vector<1x8x32xf32>
    %1 = vector.shape_cast %0 : vector<1x8x32xf32> to vector<8x32xf32>
    %c0_2 = arith.constant 0 : index
    %c0_3 = arith.constant 0 : index
    %2 = vector.load %arg4[%c0_2, %c0_3] : memref<32x32xf32, #tpu.memory_space<vmem>>, vector<32x32xf32>
    %cst = arith.constant dense<0.000000e+00> : vector<8x32xf32>
    %3 = tpu.matmul %1, %2, %cst {dimension_numbers = #tpu.dot_dimension_numbers<[1], [0], [0], [1], [0, 0, 1, 1], [], []>} : vector<8x32xf32>, vector<32x32xf32>, vector<8x32xf32> -> vector<8x32xf32>
    %4 = vector.shape_cast %3 : vector<8x32xf32> to vector<1x8x32xf32>
    %c0_4 = arith.constant 0 : index
    %c0_5 = arith.constant 0 : index
    %5 = vector.load %arg5[%c0_4, %c0_5] : memref<32x32xf32, #tpu.memory_space<vmem>>, vector<32x32xf32>
    %cst_6 = arith.constant dense<0.000000e+00> : vector<8x32xf32>
    %6 = tpu.matmul %1, %5, %cst_6 {dimension_numbers = #tpu.dot_dimension_numbers<[1], [0], [0], [1], [0, 0, 1, 1], [], []>} : vector<8x32xf32>, vector<32x32xf32>, vector<8x32xf32> -> vector<8x32xf32>
    %7 = vector.shape_cast %6 : vector<8x32xf32> to vector<1x8x32xf32>
    %c0_7 = arith.constant 0 : index
    %c0_8 = arith.constant 0 : index
    %c0_9 = arith.constant 0 : index
    %8 = vector.load %arg2[%c0_7, %c0_8, %c0_9] : memref<1x8x1xf32, #tpu.memory_space<vmem>>, vector<1x8x1xf32>
    %c0_10 = arith.constant 0 : index
    %c0_11 = arith.constant 0 : index
    %c0_12 = arith.constant 0 : index
    %9 = vector.load %arg3[%c0_10, %c0_11, %c0_12] : memref<1x1x8xf32, #tpu.memory_space<vmem>>, vector<1x1x8xf32>
    %10 = vector.broadcast %8 : vector<1x8x1xf32> to vector<1x8x8xf32>
    %11 = vector.broadcast %9 : vector<1x1x8xf32> to vector<1x8x8xf32>
    %12 = arith.subf %10, %11 : vector<1x8x8xf32>
    %cst_13 = arith.constant 1.000000e+00 : f32
    %13 = vector.broadcast %cst_13 : f32 to vector<1x8x8xf32>
    %14 = arith.addf %12, %13 : vector<1x8x8xf32>
    %cst_14 = arith.constant 5.000000e-01 : f32
    %15 = vector.broadcast %cst_14 : f32 to vector<1x8x8xf32>
    %16 = arith.mulf %14, %15 : vector<1x8x8xf32>
    %cst_15 = arith.constant 0.000000e+00 : f32
    %cst_16 = arith.constant 1.000000e+00 : f32
    %17 = vector.broadcast %cst_15 : f32 to vector<1x8x8xf32>
    %18 = arith.maximumf %17, %16 : vector<1x8x8xf32>
    %19 = vector.broadcast %cst_16 : f32 to vector<1x8x8xf32>
    %20 = arith.minimumf %19, %18 : vector<1x8x8xf32>
    %cst_17 = arith.constant 1.000000e+00 : f32
    %21 = vector.broadcast %cst_17 : f32 to vector<1x8x8xf32>
    %22 = arith.subf %21, %20 : vector<1x8x8xf32>
    %23 = tpu.iota {dimensions = array<i32: 0>} : vector<8x8xi32>
    %24 = tpu.iota {dimensions = array<i32: 1>} : vector<8x8xi32>
    %25 = arith.cmpi eq, %23, %24 : vector<8x8xi32>
    %26 = vector.shape_cast %25 : vector<8x8xi1> to vector<1x8x8xi1>
    %cst_18 = arith.constant 0.000000e+00 : f32
    %27 = vector.broadcast %cst_18 : f32 to vector<1x8x8xf32>
    %28 = arith.select %26, %27, %20 : vector<1x8x8xi1>, vector<1x8x8xf32>
    %cst_19 = arith.constant 0.000000e+00 : f32
    %29 = vector.broadcast %cst_19 : f32 to vector<1x8x8xf32>
    %30 = arith.select %26, %29, %22 : vector<1x8x8xi1>, vector<1x8x8xf32>
    %cst_20 = arith.constant dense<0.000000e+00> : vector<1x8xf32>
    %31 = vector.multi_reduction <add>, %28, %cst_20 [2] : vector<1x8x8xf32> to vector<1x8xf32>
    %32 = vector.shape_cast %31 : vector<1x8xf32> to vector<1x8x1xf32>
    %33 = vector.broadcast %32 : vector<1x8x1xf32> to vector<1x8x8xf32>
    %34 = arith.divf %28, %33 : vector<1x8x8xf32>
    %cst_21 = arith.constant dense<0.000000e+00> : vector<1x8xf32>
    %35 = vector.multi_reduction <add>, %30, %cst_21 [2] : vector<1x8x8xf32> to vector<1x8xf32>
    %36 = vector.shape_cast %35 : vector<1x8xf32> to vector<1x8x1xf32>
    %37 = vector.broadcast %36 : vector<1x8x1xf32> to vector<1x8x8xf32>
    %38 = arith.divf %30, %37 : vector<1x8x8xf32>
    "tpu.trace_start"() <{level = 10 : i32, message = "bnm,bmd->bnd"}> : () -> ()
    %cst_22 = arith.constant dense<0.000000e+00> : vector<1x8x32xf32>
    %39 = tpu.matmul %34, %4, %cst_22 {dimension_numbers = #tpu.dot_dimension_numbers<[2], [1], [1], [2], [0, 0, 0, 1, 1, 2], [0], [0]>} : vector<1x8x8xf32>, vector<1x8x32xf32>, vector<1x8x32xf32> -> vector<1x8x32xf32>
    %cst_23 = arith.constant dense<0.000000e+00> : vector<1x8x32xf32>
    %40 = tpu.matmul %38, %7, %cst_23 {dimension_numbers = #tpu.dot_dimension_numbers<[2], [1], [1], [2], [0, 0, 0, 1, 1, 2], [0], [0]>} : vector<1x8x8xf32>, vector<1x8x32xf32>, vector<1x8x32xf32> -> vector<1x8x32xf32>
    "tpu.trace_stop"() : () -> ()
    %41 = arith.addf %39, %40 : vector<1x8x32xf32>
    %42 = vector.shape_cast %41 : vector<1x8x32xf32> to vector<8x32xf32>
    %c0_24 = arith.constant 0 : index
    %c0_25 = arith.constant 0 : index
    %43 = vector.load %arg6[%c0_24, %c0_25] : memref<32x32xf32, #tpu.memory_space<vmem>>, vector<32x32xf32>
    %cst_26 = arith.constant dense<0.000000e+00> : vector<8x32xf32>
    %44 = tpu.matmul %42, %43, %cst_26 {dimension_numbers = #tpu.dot_dimension_numbers<[1], [0], [0], [1], [0, 0, 1, 1], [], []>} : vector<8x32xf32>, vector<32x32xf32>, vector<8x32xf32> -> vector<8x32xf32>
    %c0_27 = arith.constant 0 : index
    %c0_28 = arith.constant 0 : index
    %45 = vector.load %arg7[%c0_27, %c0_28] : memref<1x32xf32, #tpu.memory_space<vmem>>, vector<1x32xf32>
    %46 = vector.broadcast %45 : vector<1x32xf32> to vector<8x32xf32>
    %47 = arith.addf %44, %46 : vector<8x32xf32>
    %cst_29 = arith.constant dense<0.000000e+00> : vector<8xf32>
    %48 = vector.multi_reduction <add>, %47, %cst_29 [1] : vector<8x32xf32> to vector<8xf32>
    %49 = vector.shape_cast %48 : vector<8xf32> to vector<8x1xf32>
    %cst_30 = arith.constant 3.200000e+01 : f32
    %50 = vector.broadcast %cst_30 : f32 to vector<8x1xf32>
    %51 = arith.divf %49, %50 : vector<8x1xf32>
    %52 = vector.broadcast %51 : vector<8x1xf32> to vector<8x32xf32>
    %53 = arith.subf %47, %52 : vector<8x32xf32>
    %54 = arith.mulf %53, %53 : vector<8x32xf32>
    %cst_31 = arith.constant dense<0.000000e+00> : vector<8xf32>
    %55 = vector.multi_reduction <add>, %54, %cst_31 [1] : vector<8x32xf32> to vector<8xf32>
    %56 = vector.shape_cast %55 : vector<8xf32> to vector<8x1xf32>
    %cst_32 = arith.constant 3.200000e+01 : f32
    %57 = vector.broadcast %cst_32 : f32 to vector<8x1xf32>
    %58 = arith.divf %56, %57 : vector<8x1xf32>
    %59 = vector.broadcast %51 : vector<8x1xf32> to vector<8x32xf32>
    %60 = arith.subf %47, %59 : vector<8x32xf32>
    %cst_33 = arith.constant 9.99999974E-6 : f32
    %61 = vector.broadcast %cst_33 : f32 to vector<8x1xf32>
    %62 = arith.addf %58, %61 : vector<8x1xf32>
    %63 = math.rsqrt %62 : vector<8x1xf32>
    %64 = vector.broadcast %63 : vector<8x1xf32> to vector<8x32xf32>
    %65 = arith.mulf %60, %64 : vector<8x32xf32>
    %c0_34 = arith.constant 0 : index
    %c0_35 = arith.constant 0 : index
    %66 = vector.load %arg8[%c0_34, %c0_35] : memref<1x32xf32, #tpu.memory_space<vmem>>, vector<1x32xf32>
    %67 = vector.broadcast %66 : vector<1x32xf32> to vector<8x32xf32>
    %68 = arith.mulf %65, %67 : vector<8x32xf32>
    %c0_36 = arith.constant 0 : index
    %c0_37 = arith.constant 0 : index
    %69 = vector.load %arg9[%c0_36, %c0_37] : memref<1x32xf32, #tpu.memory_space<vmem>>, vector<1x32xf32>
    %70 = vector.broadcast %69 : vector<1x32xf32> to vector<8x32xf32>
    %71 = arith.addf %68, %70 : vector<8x32xf32>
    %72 = arith.addf %1, %71 : vector<8x32xf32>
    %73 = vector.shape_cast %72 : vector<8x32xf32> to vector<1x8x32xf32>
    %c0_38 = arith.constant 0 : index
    %c0_39 = arith.constant 0 : index
    %c0_40 = arith.constant 0 : index
    %74 = vector.load %arg10[%c0_38, %c0_39, %c0_40] : memref<1x8x32xf32, #tpu.memory_space<vmem>>, vector<1x8x32xf32>
    tpu.vector_store %arg10[%c0_38, %c0_39, %c0_40], %73 {strides = array<i32>} : memref<1x8x32xf32, #tpu.memory_space<vmem>>, vector<1x8x32xf32>,
    return
  }
  func.func @transform_0(%arg0: i32) -> (i32, i32, i32) {
    %c0_i32 = arith.constant 0 : i32
    %c0_i32_0 = arith.constant 0 : i32
    %c0_i32_1 = arith.constant 0 : i32
    return %arg0, %c0_i32, %c0_i32_0 : i32, i32, i32
  }
  func.func @transform_1(%arg0: i32) -> (i32, i32, i32) {
    %c0_i32 = arith.constant 0 : i32
    %c0_i32_0 = arith.constant 0 : i32
    %c0_i32_1 = arith.constant 0 : i32
    return %arg0, %c0_i32, %c0_i32_0 : i32, i32, i32
  }
  func.func @transform_2(%arg0: i32) -> (i32, i32, i32) {
    %c0_i32 = arith.constant 0 : i32
    %c0_i32_0 = arith.constant 0 : i32
    %c0_i32_1 = arith.constant 0 : i32
    return %arg0, %c0_i32, %c0_i32_0 : i32, i32, i32
  }
  func.func @transform_3(%arg0: i32) -> (i32, i32) {
    %c0_i32 = arith.constant 0 : i32
    %c0_i32_0 = arith.constant 0 : i32
    %c0_i32_1 = arith.constant 0 : i32
    return %c0_i32, %c0_i32_0 : i32, i32
  }
  func.func @transform_4(%arg0: i32) -> (i32, i32) {
    %c0_i32 = arith.constant 0 : i32
    %c0_i32_0 = arith.constant 0 : i32
    %c0_i32_1 = arith.constant 0 : i32
    return %c0_i32, %c0_i32_0 : i32, i32
  }
  func.func @transform_5(%arg0: i32) -> (i32, i32) {
    %c0_i32 = arith.constant 0 : i32
    %c0_i32_0 = arith.constant 0 : i32
    %c0_i32_1 = arith.constant 0 : i32
    return %c0_i32, %c0_i32_0 : i32, i32
  }
  func.func @transform_6(%arg0: i32) -> (i32, i32) {
    %c0_i32 = arith.constant 0 : i32
    %c0_i32_0 = arith.constant 0 : i32
    %c0_i32_1 = arith.constant 0 : i32
    return %c0_i32, %c0_i32_0 : i32, i32
  }
  func.func @transform_7(%arg0: i32) -> (i32, i32) {
    %c0_i32 = arith.constant 0 : i32
    %c0_i32_0 = arith.constant 0 : i32
    %c0_i32_1 = arith.constant 0 : i32
    return %c0_i32, %c0_i32_0 : i32, i32
  }
  func.func @transform_8(%arg0: i32) -> (i32, i32) {
    %c0_i32 = arith.constant 0 : i32
    %c0_i32_0 = arith.constant 0 : i32
    %c0_i32_1 = arith.constant 0 : i32
    return %c0_i32, %c0_i32_0 : i32, i32
  }
  func.func @transform_9(%arg0: i32) -> (i32, i32, i32) {
    %c0_i32 = arith.constant 0 : i32
    %c0_i32_0 = arith.constant 0 : i32
    %c0_i32_1 = arith.constant 0 : i32
    return %arg0, %c0_i32, %c0_i32_0 : i32, i32, i32
  }
}

</mosaic_0001>

<bundles_post_ra>
// kernel: tpu_custom_call.1
= control target key start
LH: loop header
LB: loop body
LE: loop exit
PB: predicated region body
PF: predicated region fallthrough
CT: control target
= control target key end

     0   :  { %s1806_s0 = inlined_call_operand.hbm [shape: f32[2,8,32], index: 0, kind: input, shape index: {}]   ;;  %s1807_s1 = inlined_call_operand.vmem [shape: f32[2,8,1], index: 1, kind: input, shape index: {}]   ;;  %s1808_s2 = inlined_call_operand.hbm [shape: f32[2,1,8], index: 2, kind: input, shape index: {}]   ;;  %s1809_s3 = inlined_call_operand.hbm [shape: f32[32,32], index: 3, kind: input, shape index: {}]   ;;  %s1810_s4 = inlined_call_operand.vmem [shape: f32[32,32], index: 4, kind: input, shape index: {}]   ;;  %s1811_s5 = inlined_call_operand.hbm [shape: f32[32,32], index: 5, kind: input, shape index: {}]   ;;  %s1812_s6 = inlined_call_operand.vmem [shape: f32[1,32], index: 6, kind: input, shape index: {}]   ;;  %s1813_s7 = inlined_call_operand.vmem [shape: f32[1,32], index: 7, kind: input, shape index: {}]   ;;  %s1814_s8 = inlined_call_operand.vmem [shape: f32[1,32], index: 8, kind: input, shape index: {}]   ;;  %s1815_s9 = inlined_call_operand.hbm [shape: f32[2,8,32], index: 9, kind: output, shape index: {}]  }
   0x1   :  { %1821 = sst [smem:[#allocation17_spill]] %s1806_s0 }
   0x2   :  { %1822 = sst [smem:[#allocation18_spill]] %s1809_s3 }
   0x3   :  { %1823 = sst [smem:[#allocation19_spill]] %s1811_s5 }
   0x4   :  { %14 = vsyncpa [#allocation3], 0 }
   0x5   :  { %16 = vsyncpa [#allocation3 + $0x1], 0 }
   0x6   :  { %17 = vsyncpa [#allocation6], 0 }
   0x7   :  { %19 = vsyncpa [#allocation6 + $0x1], 0 }
   0x8   :  { %20 = vsyncpa [#allocation9], 0 }
   0x9   :  { %21 = vsyncpa [#allocation4], 0 }
   0xa   :  { %23 = vsyncpa [#allocation4 + $0x1], 0  ;;  %s1466_s30 = smov 0   ;;  %s1468_s10 = smov 0  }
   0xb   :  { %s1470_s11 = smov 0   ;;  %s1472_s12 = smov 0  }
   0xc LB: > { %s1487_s13 = sadd.s32 4294967295, %s1403_s12   ;;  %s1015_s14 = sadd.s32 4294967294, %s1403_s12   ;;  %s1403_s12 = sphi %s1472_s12, %s1849_s12   ;;  %s1399_s11 = sphi %s1470_s11, %s1848_s11   ;;  %s1395_s10 = sphi %s1468_s10, %s1847_s10   ;;  %s1391_s30 = sphi %s1466_s30, %s1846_s30  }
   0xd   : > { %p49_p0 = scmp.ne.s32.totalorder %s1395_s10, %s1391_s30  ;;  %p1816_p1 = scmp.eq.s32.totalorder %s1487_s13, 0 }
   0xe   : > { %p257_p3 = scmp.eq.s32.totalorder %s1015_s14, 1  ;;  %p1016_p5 = scmp.ge.s32.totalorder %s1403_s12, 1 }
   0xf   : > { %p1496_p4 = por %p1816_p1, %p49_p0  ;;  %p264_p7 = scmp.lt.s32.totalorder %s1403_s12, 3 }
  0x10   : > { %p1501_p6 = por %p257_p3, %p49_p0  ;;  %s1405_s18 = smov [#allocation7]  }
  0x11   : > { %s1824_s15 = scalar_select %p1496_p4, 1, 0 }
  0x12   : > { %s1825_s16 = scalar_select %p1501_p6, 1, 0 }
  0x13   : > { %p1506_p8 = pnand %p1016_p5, %p264_p7  ;;  %s276_s19 = sshll.u32 %s1405_s18, 4  ;;  %s1510_s19 = int_to_ptr.vmem [resolvable:$true] %s276_s19 }
  0x14   : > { %1826 = sst [smem:[#allocation16_spill]] %s1825_s16  ;;  %s1406_s21 = smov [#allocation8]  }
  0x15   : > { %s1827_s17 = scalar_select %p1506_p8, 1, 0 }
  0x16   : > { %p1138_p9 = pneg %p1506_p8  ;;  %s292_s22 = sshll.u32 %s1406_s21, 4  ;;  %s1521_s22 = int_to_ptr.vmem [resolvable:$true] %s292_s22 }
  0x17   : > { %s1829_s3 = sld [smem:[#allocation18_spill]] }
  0x18   : > { %p1517_p11 = pnand %p1138_p9, %p1816_p1 }
  0x1a   : > { %p1211_p13 = pneg %p1517_p11 }
  0x1d   : > { %s1209_s25 = scalar_lea.hbm %s1829_s3, 512 }
  0x1e   : > { %p1210_p12 = scmp.ne.s32.totalorder %s1829_s3, %s1209_s25  ;;  %p1216_p5 = scmp.lt.u32.totalorder %s1209_s25, %s1829_s3 }
  0x20   : > { %p1212_p0 = pnand %p1211_p13, %p1210_p12 }
  0x22   : > { %p1213_p3 = pneg %p1212_p0 }
  0x24   : > { %p1218_p7 = pnand %p1216_p5, %p1213_p3 }
  0x26   : > { %1221 = shalt.err (!%p1218_p7)
}
  0x27   : > { %s1222_s14 = scalar_lea.vmem %s1510_s19, 512  ;;  %p1230_p2 = scmp.lt.s32.totalorder %s1510_s19, %s1510_s19 }
  0x28   : > { %p1223_p9 = scmp.ne.s32.totalorder %s1510_s19, %s1222_s14  ;;  %p1231_p12 = scmp.lt.s32.totalorder %s1222_s14, %s1222_s14 }
  0x2a   : > { %p1225_p10 = pnand %p1223_p9, %p1211_p13  ;;  %p1232_p0 = por %p1231_p12, %p1230_p2 }
  0x2c   : > { %p1226_p1 = pneg %p1225_p10 }
  0x2e   : > { %p1233_p6 = pnand %p1232_p0, %p1226_p1 }
  0x30   : > { %1236 = shalt.err (!%p1233_p6)
}
  0x31   : > { %s1407_s18 = smov 128   ;;  %s1408_s21 = smov 8  }
  0x32   : > { %1141 = dma.hbm_to_vmem [thread:$0]  (!%p1517_p11), %s1829_s3, 512, %s1510_s19, [#allocation6], %s1407_s18, %s1407_s18, %s1408_s21  }
  0x33   : > { %s1830_s5 = sld [smem:[#allocation19_spill]] }
  0x39   : > { %s1237_s27 = scalar_lea.hbm %s1830_s5, 512 }
  0x3a   : > { %p1238_p2 = scmp.ne.s32.totalorder %s1830_s5, %s1237_s27  ;;  %p1244_p10 = scmp.lt.u32.totalorder %s1237_s27, %s1830_s5 }
  0x3c   : > { %p1240_p1 = pnand %p1238_p2, %p1211_p13 }
  0x3e   : > { %p1241_p6 = pneg %p1240_p1 }
  0x40   : > { %p1246_p3 = pnand %p1244_p10, %p1241_p6 }
  0x42   : > { %1249 = shalt.err (!%p1246_p3)
}
  0x43   : > { %s1250_s19 = scalar_lea.vmem %s1521_s22, 512  ;;  %p1258_p12 = scmp.lt.s32.totalorder %s1521_s22, %s1521_s22 }
  0x44   : > { %p1251_p5 = scmp.ne.s32.totalorder %s1521_s22, %s1250_s19  ;;  %p1259_p0 = scmp.lt.s32.totalorder %s1250_s19, %s1250_s19 }
  0x46   : > { %p1253_p7 = pnand %p1251_p5, %p1211_p13  ;;  %p1260_p2 = por %p1259_p0, %p1258_p12 }
  0x48   : > { %p1254_p9 = pneg %p1253_p7 }
  0x4a   : > { %p1261_p1 = pnand %p1260_p2, %p1254_p9 }
  0x4c   : > { %1264 = shalt.err (!%p1261_p1)
}
  0x4d   : > { %1144 = dma.hbm_to_vmem [thread:$0]  (!%p1517_p11), %s1830_s5, 512, %s1521_s22, [#allocation9], %s1407_s18, %s1407_s18, %s1408_s21  }
  0x4e   : > { %s1576_s24 = sadd.s32 1, %s1403_s12   ;;  %s36_s20 = sadd.s32 1, %s1399_s11 }
  0x4f   : > { %s33_s25 = ssub.s32 %s1403_s12, %s1576_s24  ;;  %p43_p13 = scmp.ne.s32.totalorder %s1399_s11, %s1395_s10 }
  0x50   : > { %p34_p6 = scmp.eq.s32.totalorder %s33_s25, 0  ;;  %p44_p10 = scmp.eq.s32.totalorder %s1403_s12, 0 }
  0x51   : > { %p1831_p3 = scmp.eq.s32.totalorder %s1487_s13, 1  ;;  %p1158_p7 = scmp.lt.s32.totalorder %s1403_s12, 2 }
  0x52   : > { %s1592_s27 = scalar_select %p34_p6, %s1399_s11, %s36_s20  }
  0x53   : > { %p1586_p5 = por %p1831_p3, %p43_p13  ;;  %p45_p9 = por %p44_p10, %p43_p13 }
  0x54   : > { %s1595_s28 = sand.u32 1, %s1399_s11   ;;  %s1021_s18 = sshll.u32 %s1403_s12, 7 }
  0x55   : > { %s1832_s26 = scalar_select %p1586_p5, 1, 0 }
  0x56   : > { %s1020_s22 = sshll.u32 %s1595_s28, 3  ;;  %s1833_s0 = sld [smem:[#allocation17_spill]] }
  0x57   : > { %s319_s19 = scalar_lea.vmem [#allocation2], %s1020_s22  ;;  %p1606_p11 = pnand %p1158_p7, %p45_p9 }
  0x58   : > { %s326_s16 = sshll.u32 %s319_s19, 4  ;;  %s316_s25 = scalar_lea.sflag [#allocation3], %s1595_s28  ;;  %s1604_s16 = int_to_ptr.vmem [resolvable:$true] %s326_s16 }
  0x59   : > { %p1267_p0 = pneg %p1606_p11 }
  0x5c   : > { %s1602_s14 = scalar_lea.hbm %s1833_s0, %s1021_s18  ;;  %s1270_s21 = scalar_lea.hbm %s1833_s0, 256 }
  0x5d   : > { %s1265_s3 = scalar_lea.hbm %s1602_s14, 128  ;;  %p1271_p13 = scmp.lt.u32.totalorder %s1602_s14, %s1833_s0 }
  0x5e   : > { %p1266_p12 = scmp.ne.s32.totalorder %s1602_s14, %s1265_s3  ;;  %p1272_p6 = scmp.lt.u32.totalorder %s1270_s21, %s1265_s3 }
  0x5f   : > { %p1274_p3 = scmp.lt.u32.totalorder %s1265_s3, %s1602_s14 }
  0x60   : > { %p1268_p2 = pnand %p1267_p0, %p1266_p12  ;;  %p1273_p10 = por %p1272_p6, %p1271_p13 }
  0x62   : > { %p1269_p1 = pneg %p1268_p2  ;;  %p1275_p7 = por %p1274_p3, %p1273_p10 }
  0x64   : > { %p1276_p9 = pnand %p1275_p7, %p1269_p1 }
  0x66   : > { %1279 = shalt.err (!%p1276_p9)
}
  0x67   : > { %s1280_s20 = scalar_lea.vmem %s1604_s16, 128  ;;  %s1409_s22 = smov [#allocation2]  }
  0x68   : > { %p1281_p12 = scmp.ne.s32.totalorder %s1604_s16, %s1280_s20  ;;  %s1285_s18 = sshll.u32 %s1409_s22, 4  ;;  %s1286_s18 = int_to_ptr.vmem [resolvable:$false] %s1285_s18 }
  0x69   : > { %s1287_s29 = scalar_lea.vmem %s1286_s18, 256  ;;  %p1288_p4 = scmp.lt.s32.totalorder %s1604_s16, %s1286_s18 }
  0x6a   : > { %p1283_p2 = pnand %p1281_p12, %p1267_p0  ;;  %p1289_p13 = scmp.lt.s32.totalorder %s1287_s29, %s1280_s20 }
  0x6c   : > { %p1284_p5 = pneg %p1283_p2  ;;  %p1290_p6 = por %p1289_p13, %p1288_p4 }
  0x6e   : > { %p1291_p10 = pnand %p1290_p6, %p1284_p5 }
  0x70   : > { %1294 = shalt.err (!%p1291_p10)
}
  0x71   : > { %1148 = dma.hbm_to_vmem [thread:$0]  (!%p1606_p11), %s1602_s14, 128, %s1604_s16, %s316_s25  }
  0x72   : > { %s1022_s3 = sshll.u32 %s1403_s12, 4  ;;  %s343_s21 = scalar_lea.vmem [#allocation5], %s1595_s28 }
  0x73   : > { %s350_s19 = sshll.u32 %s343_s21, 4  ;;  %s1642_s18 = scalar_lea.hbm %s1808_s2, %s1022_s3  ;;  %s351_s19 = int_to_ptr.vmem [resolvable:$true] %s350_s19 }
  0x74   : > { %s1835_s20 = sand.u32 1, %s1403_s12   ;;  %s1295_s5 = scalar_lea.hbm %s1642_s18, 16 }
  0x75   : > { %s341_s29 = scalar_lea.sflag [#allocation6], %s1835_s20  ;;  %p1296_p4 = scmp.ne.s32.totalorder %s1642_s18, %s1295_s5 }
  0x76   : > { %s1300_s16 = scalar_lea.hbm %s1808_s2, 32  ;;  %p1301_p3 = scmp.lt.u32.totalorder %s1642_s18, %s1808_s2 }
  0x77   : > { %p1298_p5 = pnand %p1296_p4, %p1267_p0  ;;  %p1302_p7 = scmp.lt.u32.totalorder %s1300_s16, %s1295_s5 }
  0x78   : > { %p1304_p12 = scmp.lt.u32.totalorder %s1295_s5, %s1642_s18 }
  0x79   : > { %p1299_p1 = pneg %p1298_p5  ;;  %p1303_p9 = por %p1302_p7, %p1301_p3 }
  0x7b   : > { %p1305_p2 = por %p1304_p12, %p1303_p9 }
  0x7d   : > { %p1306_p13 = pnand %p1305_p2, %p1299_p1 }
  0x7f   : > { %1309 = shalt.err (!%p1306_p13)
}
  0x80   : > { %s1310_s3 = scalar_lea.vmem %s351_s19, 16  ;;  %s1410_s21 = smov [#allocation5]  }
  0x81   : > { %p1311_p6 = scmp.ne.s32.totalorder %s351_s19, %s1310_s3  ;;  %s1315_s22 = sshll.u32 %s1410_s21, 4  ;;  %s1316_s22 = int_to_ptr.vmem [resolvable:$false] %s1315_s22 }
  0x82   : > { %s1317_s20 = scalar_lea.vmem %s1316_s22, 32  ;;  %p1318_p5 = scmp.lt.s32.totalorder %s351_s19, %s1316_s22 }
  0x83   : > { %p1313_p10 = pnand %p1311_p6, %p1267_p0  ;;  %p1319_p8 = scmp.lt.s32.totalorder %s1317_s20, %s1310_s3 }
  0x85   : > { %p1314_p4 = pneg %p1313_p10  ;;  %p1320_p3 = por %p1319_p8, %p1318_p5 }
  0x87   : > { %p1321_p7 = pnand %p1320_p3, %p1314_p4 }
  0x89   : > { %1324 = shalt.err (!%p1321_p7)
}
  0x8a   : > { %1151 = dma.hbm_to_vmem [thread:$0]  (!%p1606_p11), %s1642_s18, 16, %s351_s19, %s341_s29  }
  0x8b   : > { %p1836_p1 = scmp.ne.s32.totalorder %s1827_s17, 0 }
  0x8c   : > { %s1668_s5 = sand.u32 (!%p1836_p1), 1, %s1395_s10   ;;  %p1837_p8 = scmp.ne.s32.totalorder (!%p1836_p1), %s1824_s15, 0 }
  0x8d   : > { %359 = sbr.rel (%p1836_p1) target bundleno = 1226 (0x4ca), region = 56  ;;  %s1024_s28 = sshll.u32 (!%p1836_p1), %s1668_s5, 3 }
  0x8e   : > { %s362_s14 = scalar_lea.sflag (!%p1836_p1), [#allocation3], %s1668_s5  ;;  %s1674_s16 = scalar_lea.vmem (!%p1836_p1), [#allocation2], %s1024_s28 }
  0x94   : > { %1370 = dma.done.wait (%p1837_p8), %s362_s14, 128  }
  0x95   : > { %1372 = vsyncadd (%p1837_p8), %s362_s14, 4294967168  ;;  %s370_s17 = sand.u32 1, %s1487_s13   ;;  %s373_s19 = scalar_lea.vmem [#allocation5], %s1668_s5 }
  0x96   : > { %s371_s23 = scalar_lea.sflag [#allocation6], %s370_s17 }
  0x97   : > { %1374 = dma.done.wait (%p1837_p8), %s371_s23, 16  }
  0x98   : > { %1376 = vsyncadd (%p1837_p8), %s371_s23, 4294967280  ;;  %p1838_p11 = scmp.eq.s32.totalorder %s1487_s13, 0 }
  0x9a   : > { %1378 = dma.done.wait (%p1838_p11), [#allocation6], 512   ;;  %p1839_p0 = pmov %p1838_p11 }
  0x9c   : > { %1380 = vsyncadd (%p1839_p0), [#allocation6], 4294966784  ;;  %p1840_p9 = pmov %p1839_p0 }
  0x9d   : > { %p1841_p12 = pmov %p1839_p0 }
  0x9e   : > { %1382 = dma.done.wait (%p1840_p9), [#allocation9], 512  }
  0x9f   : > { %1384 = vsyncadd (%p1841_p12), [#allocation9], 4294966784  ;;  %p424_p2 = scmp.lt.s32.totalorder %s1487_s13, 1  ;;  %v1411_v0 = vmov 0   ;;  %v1412_v1 = vmov 0.0|0.0   ;;  %vm1413_vm0 = vmmov 0   ;;  %v600_v19 = vlaneseq }
  0xa0   : > { %1202 = vset.pattern.permute.xlu0 %v1411_v0  ;;  %1110 = vmatprep.subr.bf16.mxu1 %v1412_v1  ;;  %v1414_v2 = vmov 0.0   ;;  %v507_v4 = vld [vmem:[%s1810_s4] sm:$0xff]  ;;  %v508_v5 = vld [vmem:[%s1810_s4 + $0x8] sm:$0xff]  ;;  %v429_v7 = vld [vmem:[#allocation7] sm:$0xff]  ;;  %vm433_vm1 = vcmask 261120   ;;  %vm607_vm3 = vcmask 64512  }
  0xa1   : > { %s425_s15 = scalar_select %p424_p2, %s1487_s13, 1  ;;  %1104 = vmatprep.subr.bf16.mxu0 %v1412_v1  ;;  %1080 = vmatprep.mubr.msk.f32.mxu1 %vm1413_vm0, %v1414_v2  ;;  %v1111_v6 = vpack.c.bf16 %v508_v5, %v507_v4  ;;  %v430_v8 = vld [vmem:[#allocation7 + $0x8] sm:$0xff]  ;;  %v509_v9 = vld [vmem:[%s1810_s4 + $0x10] sm:$0xff]  ;;  %v431_v12 = vld [vmem:[#allocation7 + $0x10] sm:$0xff]  ;;  %v601_v22 = vshrl.u32 %v600_v19, 7  ;;  %v603_v23 = vand.u32 127, %v600_v19 }
  0xa2   : > { %1069 = vmatprep.mubr.msk.f32.mxu0 %vm1413_vm0, %v1414_v2  ;;  %v1105_v10 = vpack.c.bf16 %v430_v8, %v429_v7  ;;  %v510_v11 = vld [vmem:[%s1810_s4 + $0x18] sm:$0xff]  ;;  %v432_v14 = vld [vmem:[#allocation7 + $0x18] sm:$0xff]  ;;  %v1031_v17 = vld [vmem:[%s373_s19] ss:$0 sm:$0xff]  ;;  %s1039_s3 = sshll.u32 %s1487_s13, 7  ;;  %s423_s21 = scalar_lea.vmem [#allocation10], %s1024_s28 }
  0xa3   : > { %s1028_s18 = sshll.u32 %s425_s15, 3  ;;  %1112 = vmatpush3.bf16.msra.mxu1 %v1111_v6  ;;  %v1114_v13 = vpack.c.bf16 %v510_v11, %v509_v9  ;;  %v1108_v15 = vpack.c.bf16 %v432_v14, %v431_v12  ;;  %v1720_v16 = vld [vmem:[%s1674_s16] sm:$0xff]  ;;  %vm604_vm2 = vcmp.eq.s32.totalorder %v601_v22, %v603_v23  ;;  %v764_v32 = vld [vmem:[#allocation8] sm:$0xff]  ;;  %s894_s22 = sshll.u32 %s423_s21, 4  ;;  %s1763_s22 = int_to_ptr.vmem [resolvable:$true] %s894_s22 }
  0xa4   : > { %s427_s25 = scalar_lea.vmem %s1807_s1, %s1028_s18  ;;  %1113 = vmatprep.subr.bf16.mxu1 %v1412_v1  ;;  %1106 = vmatpush3.bf16.msra.mxu0 %v1105_v10  ;;  %v765_v33 = vld [vmem:[#allocation8 + $0x8] sm:$0xff]  ;;  %v766_v34 = vld [vmem:[#allocation8 + $0x10] sm:$0xff]  ;;  %v767_v36 = vld [vmem:[#allocation8 + $0x18] sm:$0xff]  ;;  %s1761_s17 = scalar_lea.hbm %s1815_s9, %s1039_s3 }
  0xa5   : > { %v581_v3 = vld [vmem:[%s427_s25] sm:$0xff]  ;;  %1107 = vmatprep.subr.bf16.mxu0 %v1412_v1  ;;  %v1117_v35 = vpack.c.bf16 %v765_v33, %v764_v32  ;;  %v1120_v37 = vpack.c.bf16 %v767_v36, %v766_v34  ;;  %s881_s23 = scalar_lea.sflag [#allocation4], %s1668_s5  ;;  %s1325_s13 = scalar_lea.vmem %s1763_s22, 128 }
  0xa6   : > { %585 = vperm.xlu0 %1202, %v581_v3   ;;  %v1034_v50 = vld [vmem:[%s1812_s6] ss:$0 sm:$0xff]  ;;  %p1326_p13 = scmp.ne.s32.totalorder %s1763_s22, %s1325_s13  ;;  %p1842_p6 = scmp.ne.s32.totalorder %s1832_s26, 0 }
  0xa7   : > { %1115 = vmatpush3.bf16.msra.mxu1 %v1114_v13  ;;  %v1036_v0 = vld [vmem:[%s1813_s7] ss:$0 sm:$0xff]  ;;  %s1415_s28 = smov [#allocation10]  }
  0xa8   : > { %1109 = vmatpush3.bf16.msra.mxu0 %v1108_v15  ;;  %1116 = vmatprep.subr.bf16.mxu1 %v1412_v1  ;;  %p1327_p10 = pnand %p1326_p13, %p1842_p6  ;;  %s1329_s15 = sshll.u32 %s1415_s28, 4  ;;  %s1330_s15 = int_to_ptr.vmem [resolvable:$false] %s1329_s15 }
  0xa9   : > { %1083 = vmatprep.subr.mxu0 %v1414_v2  ;;  %s1331_s16 = scalar_lea.vmem %s1330_s15, 256  ;;  %p1332_p5 = scmp.lt.s32.totalorder %s1763_s22, %s1330_s15 }
  0xaa   : > { %1081 = vmatmul.mubr.msk.f32.vlgmr.msra.gmra.mrb[0].mxu1 %vm433_vm1, %v1720_v16  ;;  %p1328_p4 = pneg %p1327_p10  ;;  %p1333_p3 = scmp.lt.s32.totalorder %s1331_s16, %s1325_s13 }
  0xab   : > { %1070 = vmatmul.mubr.msk.f32.vlgmr.msra.gmra.mrb[0].mxu0 %vm433_vm1, %v1720_v16  ;;  %1101 = vmatprep.mubr.msk.f32.mxu1 %vm1413_vm0, %v1414_v2 }
  0xac   : > { %1085 = vmatprep.mubr.msk.f32.mxu0 %vm1413_vm0, %v1414_v2  ;;  %1118 = vmatpush3.bf16.msra.mxu1 %v1117_v35  ;;  %p1334_p7 = por %p1333_p3, %p1332_p5 }
  0xad   : > { %1119 = vmatprep.subr.bf16.mxu1 %v1412_v1 }
  0xae   : > { %p1335_p1 = pnand %p1334_p7, %p1328_p4 }
  0xb0   : > { %1121 = vmatpush3.bf16.msra.mxu1 %v1120_v37 }
 0x125   : > { %v586_v18 = vpop.permute.xlu0 %585 }
 0x126   : > { %v594_v20 = vsub.f32 %v586_v18, %v1031_v17 }
 0x128   : > { %v595_v21 = vadd.f32 1.0, %v594_v20 }
 0x12a   : > { %v596_v24 = vmul.f32 0.5, %v595_v21 }
 0x12c   : > { %v597_v25 = vmax.f32 %v596_v24, 0.0 }
 0x12e   : > { %v598_v26 = vmin.f32 %v597_v25, 1.0 }
 0x130   : > { %v605_v27 = vsel %vm604_vm2, 0.0, %v598_v26  ;;  %v599_v28 = vsub.f32 1.0, %v598_v26 }
 0x131   : > { %v608_v29 = vsel %vm607_vm3, %v605_v27, 0.0 }
 0x132   : > { %609 = vadd.xlane.f32.xlu1 %v608_v29  ;;  %v606_v30 = vsel %vm604_vm2, 0.0, %v599_v28 }
 0x133   : > { %v613_v31 = vsel %vm607_vm3, %v606_v30, 0.0 }
 0x134   : > { %614 = vadd.xlane.f32.xlu0 %v613_v31 }
 0x17d   : > { %v577_v38 = vpop.f32.mrb[0].mxu1 }
 0x17e   : > { %v1082_v39 = vpop.f32.mrb[1].mxu1  ;;  %1084 = vmatpush3.msra.mxu0 %v577_v38  ;;  %v503_v40 = vpop.f32.mrb[0].mxu0 }
 0x17f   : > { %v1071_v41 = vpop.f32.mrb[1].mxu0  ;;  %1088 = vmatprep.subr.mxu0 %v1414_v2 }
 0x1bf   : > { %v610_v43 = vpop.xlane.xlu1 %609 }
 0x1c1   : > { %v615_v42 = vpop.xlane.xlu0 %614 }
 0x1c2   : > { %1203 = vrcp.f32 %v615_v42 }
 0x1c3   : > { %1205 = vrcp.f32 %v610_v43 }
 0x1cc   : > { %v1204_v44 = vpop.eup %1203 }
 0x1cd   : > { %v617_v45 = vmul.f32 %v1204_v44, %v606_v30  ;;  %v1206_v46 = vpop.eup %1205 }
 0x1ce   : > { %v612_v47 = vmul.f32 %v1206_v46, %v605_v27 }
 0x1cf   : > { %1086 = vmatmul.mubr.msk.f32.vlgmr.msra.gmra.mrb[2].mxu0 %vm607_vm3, %v617_v45 }
 0x1d0   : > { %1089 = vmatpush3.msra.mxu0 %v503_v40  ;;  %1090 = vmatprep.mubr.msk.f32.mxu0 %vm1413_vm0, %v1414_v2  ;;  %v1037_v2 = vld [vmem:[%s1814_s8] ss:$0 sm:$0xff] }
 0x1d7   : > { %1091 = vmatmul.mubr.msk.f32.vlgmr.msra.gmra.mrb[2].mxu0 %vm607_vm3, %v612_v47 }
 0x2aa   : > { %v760_v48 = vpop.f32.mrb[2].mxu0 }
 0x2ab   : > { %v1092_v49 = vpop.f32.mrb[3].mxu0  ;;  %1102 = vmatmul.mubr.msk.f32.vlgmr.msra.gmra.mrb[2].mxu1 %vm433_vm1, %v760_v48 }
 0x37e   : > { %v844_v51 = vpop.f32.mrb[2].mxu1 }
 0x37f   : > { %v845_v52 = vadd.f32 %v1034_v50, %v844_v51  ;;  %v1103_v53 = vpop.f32.mrb[3].mxu1 }
 0x381   : > { %v848_v54 = vsel %vm433_vm1, %v845_v52, 0.0 }
 0x382   : > { %849 = vadd.xlane.f32.xlu1 %v848_v54 }
 0x40f   : > { %v850_v55 = vpop.xlane.xlu1 %849 }
 0x410   : > { %v852_v56 = vmul.f32 0.03125, %v850_v55 }
 0x412   : > { %v853_v57 = vsub.f32 %v845_v52, %v852_v56 }
 0x414   : > { %v854_v58 = vmul.f32 %v853_v57, %v853_v57 }
 0x416   : > { %v855_v59 = vsel %vm433_vm1, %v854_v58, 0.0 }
 0x417   : > { %856 = vadd.xlane.f32.xlu1 %v855_v59 }
 0x4a4   : > { %v857_v60 = vpop.xlane.xlu1 %856 }
 0x4a5   : > { %v858_v61 = vmul.f32 0.03125, %v857_v60 }
 0x4a7   : > { %v859_v62 = vadd.f32 1e-05, %v858_v61 }
 0x4a9   : > { %1207 = vrsqrt.f32 %v859_v62 }
 0x4b3   : > { %v1208_v63 = vpop.eup %1207 }
 0x4b4   : > { %v861_v1 = vmul.f32 %v1208_v63, %v853_v57 }
 0x4b6   : > { %v869_v3 = vmul.f32 %v1036_v0, %v861_v1 }
 0x4b8   : > { %v877_v4 = vadd.f32 %v1037_v2, %v869_v3 }
 0x4ba   : > { %v878_v5 = vadd.f32 %v877_v4, %v1720_v16 }
 0x4bc   : > { %879 = vst.msk [vmem:[%s423_s21] sm:$0xff] %vm433_vm1, %v878_v5 }
 0x4bd   : > { %1338 = shalt.err (!%p1335_p1)
}
 0x4be   : > { %s1339_s5 = scalar_lea.hbm %s1761_s17, 128  ;;  %s1343_s29 = scalar_lea.hbm %s1815_s9, 256 }
 0x4bf   : > { %p1340_p8 = scmp.ne.s32.totalorder %s1761_s17, %s1339_s5  ;;  %p1344_p9 = scmp.lt.u32.totalorder %s1761_s17, %s1815_s9 }
 0x4c0   : > { %p1345_p12 = scmp.lt.u32.totalorder %s1343_s29, %s1339_s5  ;;  %p1347_p13 = scmp.lt.u32.totalorder %s1339_s5, %s1761_s17 }
 0x4c1   : > { %p1341_p11 = pnand %p1340_p8, %p1842_p6 }
 0x4c2   : > { %p1346_p2 = por %p1345_p12, %p1344_p9 }
 0x4c3   : > { %p1342_p0 = pneg %p1341_p11 }
 0x4c4   : > { %p1348_p10 = por %p1347_p13, %p1346_p2 }
 0x4c6   : > { %p1349_p4 = pnand %p1348_p10, %p1342_p0 }
 0x4c8   : > { %1352 = shalt.err (!%p1349_p4)
}
 0x4c9   : > { %1136 = dma.vmem_to_hbm [thread:$0]  (%p1842_p6), %s1763_s22, 128, %s1761_s17, %s881_s23  }
 0x4ca PF: > { %s1843_s3 = sld [smem:[#allocation16_spill]]  ;;  %s906_s21 = sand.u32 1, %s1391_s30  }
 0x4cb   : > { %p1845_p3 = scmp.ge.s32.totalorder %s1403_s12, 2  ;;  %s907_s20 = scalar_lea.sflag [#allocation4], %s906_s21 }
 0x4d0   : > { %p1844_p5 = scmp.ne.s32.totalorder %s1843_s3, 0 }
 0x4d2   : > { %p1153_p7 = pnand %p1845_p3, %p1844_p5 }
 0x4d4   : > { %1386 = dma.done.wait (!%p1153_p7), %s907_s20, 128  }
 0x4d5   : > { %1388 = vsyncadd (!%p1153_p7), %s907_s20, 4294967168  ;;  %p26_p1 = scmp.ge.s32.totalorder %s1576_s24, 4   ;;  %s1846_s30 = smov %s1395_s10 }
 0x4d6   : > { %s1847_s10 = smov %s1399_s11  ;;  %s1848_s11 = smov %s1592_s27 }
 0x4d7   : > { %s1849_s12 = smov %s1576_s24  ;;  %28 = sbr.rel (!%p26_p1) target bundleno = 12 (0xc), region = 125 }
 0x4de   :  { %912 = vsyncpa [#allocation3], 1 }
 0x4df   :  { %914 = vsyncpa [#allocation3 + $0x1], 1 }
 0x4e0   :  { %915 = vsyncpa [#allocation6], 1 }
 0x4e1   :  { %917 = vsyncpa [#allocation6 + $0x1], 1 }
 0x4e2   :  { %918 = vsyncpa [#allocation9], 1 }
 0x4e3   :  { %919 = vsyncpa [#allocation4], 1 }
 0x4e4   :  { %921 = vsyncpa [#allocation4 + $0x1], 1 }

</bundles_post_ra>
